<compile_context>
chip_gen: v5e
topology: v5e:2x2
jax: 0.10.0
libtpu: 0.0.40
codegen_flags: <defaults>
</compile_context>

<pallas_src>
import functools

import jax
import jax.numpy as jnp
import numpy as np
from jax.experimental import pallas as pl
from jax.experimental.pallas import tpu as pltpu

LANE = 128


def _round_up(n, m):
    return ((n + m - 1) // m) * m


def _default_act_dtype():
    """bf16 activations on chips with a bf16 VPU/EUP (v6e/v7x), f32 otherwise."""
    try:
        kind = jax.devices()[0].device_kind.lower()
    except Exception:
        return jnp.float32
    if any(v in kind for v in ("v2", "v3", "v4", "v5")):
        return jnp.float32
    return jnp.bfloat16


def critic_kernel(x_ref, w1_ref, b1_ref, w2_ref, b2_ref, w3_ref, b3_ref, o_ref,
                  *, act_dtype):
    """One batch tile of the fused 3-layer MLP, features-major.

    x_ref  : (D_pad, TB)     bf16   batch tile (features zero-padded), batch on lanes
    w1_ref : (H_pad, D_pad)  bf16   PyTorch (out, in) layout; VMEM-resident
    b1_ref : (H_pad, 1)      f32
    w2_ref : (H_pad, H_pad)  bf16
    b2_ref : (H_pad, 1)      f32
    w3_ref : (1, H_pad)      bf16   final layer as a row
    b3_ref : (1, 1)          f32
    o_ref  : (1, TB)         f32    lane-dense value row for this tile
    """
    x = x_ref[...]

    # Layer 1: bf16 MXU matmul with f32 accumulation; bias in f32, tanh in
    # act_dtype (bf16 on v6e/v7x to halve EUP work, f32 on v5e).
    a1 = jnp.dot(w1_ref[...], x, preferred_element_type=jnp.float32) + b1_ref[...]
    h1 = jnp.tanh(a1.astype(act_dtype))

    # Layer 2.
    a2 = jnp.dot(w2_ref[...], h1.astype(w2_ref.dtype),
                 preferred_element_type=jnp.float32) + b2_ref[...]
    h2 = jnp.tanh(a2.astype(act_dtype))

    # Layer 3 (H -> 1): (1, H) @ (H, TB) -> (1, TB).  No transpose needed;
    # the per-tile output is a dense 128-lane row (unmasked stores).
    v = jnp.dot(w3_ref[...], h2.astype(w3_ref.dtype),
                preferred_element_type=jnp.float32) + b3_ref[...]
    o_ref[...] = v.astype(o_ref.dtype)


def critic_forward(x, params, *, tile_b=4096, act_dtype=None):
    """value = Critic(x); x is (B, state_dim) float32, returns (B, 1) float32."""
    w1, b1, w2, b2, w3, b3 = params
    B, D = x.shape
    h_pad, d_pad = w1.shape
    if act_dtype is None:
        act_dtype = _default_act_dtype()

    # Batch tile: multiple of 128 (lane-dense), capped so small batches keep
    # a single grid step (the kernel is pure fixed overhead at small B).
    tb = min(int(tile_b), _round_up(B, LANE))
    tb = _round_up(tb, LANE)
    b_pad = _round_up(B, tb)
    g = b_pad // tb

    # v7x: prefer an even number of tiles so both TensorCores get work
    # (best-effort; only applied when rounding actually yields an even grid).
    if g > 1 and g % 2 == 1:
        tb_even = _round_up(-(-B // (g + 1)), LANE)
        if tb_even >= LANE:
            b_pad_even = _round_up(B, tb_even)
            if (b_pad_even // tb_even) % 2 == 0:
                tb, b_pad, g = tb_even, b_pad_even, b_pad_even // tb_even

    # Single fused pad + cast + transpose of x into features-major bf16 layout.
    xp = jnp.zeros((d_pad, b_pad), w1.dtype).at[:D, :B].set(x.astype(w1.dtype).T)

    kernel = functools.partial(critic_kernel, act_dtype=act_dtype)

    out = pl.pallas_call(
        kernel,
        out_shape=jax.ShapeDtypeStruct((1, b_pad), jnp.float32),
        grid=(g,),
        in_specs=[
            pl.BlockSpec((d_pad, tb), lambda i: (0, i)),      # x: one batch tile / step
            pl.BlockSpec((h_pad, d_pad), lambda i: (0, 0)),   # w1 (pinned in VMEM)
            pl.BlockSpec((h_pad, 1), lambda i: (0, 0)),       # b1
            pl.BlockSpec((h_pad, h_pad), lambda i: (0, 0)),   # w2
            pl.BlockSpec((h_pad, 1), lambda i: (0, 0)),       # b2
            pl.BlockSpec((1, h_pad), lambda i: (0, 0)),       # w3 (row)
            pl.BlockSpec((1, 1), lambda i: (0, 0)),           # b3
        ],
        out_specs=pl.BlockSpec((1, tb), lambda i: (0, i)),    # lane-dense value row
        compiler_params=pltpu.CompilerParams(
            dimension_semantics=("parallel",),  # shard batch tiles across TCs on v7x
        ),
    )(xp, w1, b1, w2, b2, w3, b3)

    return out[0, :B].reshape(B, 1)


def init_params(key, state_dim, hidden_size, matmul_dtype=jnp.bfloat16):
    """Orthogonal init (matches torch layer_init), stored padded, (out, in) layout."""
    d_pad = _round_up(state_dim, 16)     # bf16 sublane packing of the input dim
    h_pad = _round_up(hidden_size, LANE)

    k1, k2, k3 = jax.random.split(key, 3)
    ortho = jax.nn.initializers.orthogonal
    w1 = ortho(scale=float(np.sqrt(2.0)), column_axis=-1)(
        k1, (hidden_size, state_dim), jnp.float32)
    w2 = ortho(scale=float(np.sqrt(2.0)), column_axis=-1)(
        k2, (hidden_size, hidden_size), jnp.float32)
    w3 = ortho(scale=1.0, column_axis=-1)(k3, (1, hidden_size), jnp.float32)

    # Zero-pad to TPU-friendly shapes; zero rows/cols are inert.
    w1p = (jnp.zeros((h_pad, d_pad), jnp.float32)
           .at[:hidden_size, :state_dim].set(w1).astype(matmul_dtype))
    w2p = (jnp.zeros((h_pad, h_pad), jnp.float32)
           .at[:hidden_size, :hidden_size].set(w2).astype(matmul_dtype))
    w3p = (jnp.zeros((1, h_pad), jnp.float32)
           .at[:, :hidden_size].set(w3).astype(matmul_dtype))
    b1 = jnp.zeros((h_pad, 1), jnp.float32)   # layer_init bias_const = 0.0
    b2 = jnp.zeros((h_pad, 1), jnp.float32)
    b3 = jnp.zeros((1, 1), jnp.float32)
    return (w1p, b1, w2p, b2, w3p, b3)


def reference_forward(x, params, act_dtype):
    """Pure-JAX reference mirroring the kernel's precision pipeline."""
    w1, b1, w2, b2, w3, b3 = params
    h_pad, d_pad = w1.shape
    B, D = x.shape
    xp = jnp.zeros((d_pad, B), w1.dtype).at[:D, :].set(x.astype(w1.dtype).T)
    a1 = jnp.dot(w1, xp, preferred_element_type=jnp.float32) + b1
    h1 = jnp.tanh(a1.astype(act_dtype))
    a2 = jnp.dot(w2, h1.astype(w2.dtype), preferred_element_type=jnp.float32) + b2
    h2 = jnp.tanh(a2.astype(act_dtype))
    v = jnp.dot(w3, h2.astype(w3.dtype), preferred_element_type=jnp.float32) + b3
    return v[0].reshape(B, 1).astype(jnp.float32)


if __name__ == "__main__":
    batch = 8
    state_dim = 12      # obs_act = concat(obs, act)
    hidden_size = 32

    act_dtype = _default_act_dtype()
    # Tolerance: bf16 matmuls / bf16 tanh (on v6e/v7x) vs XLA reference.
    rtol = atol = 2e-2

    key = jax.random.PRNGKey(0)
    kx, kx2, kp, kb = jax.random.split(key, 4)
    params = init_params(kp, state_dim, hidden_size)

    # Small case: single grid step.
    x = jax.random.normal(kx, (batch, state_dim), dtype=jnp.float32)
    out = jax.block_until_ready(critic_forward(x, params))
    ref = reference_forward(x, params, act_dtype)
    assert out.shape == (batch, 1)
    np.testing.assert_allclose(np.asarray(out), np.asarray(ref), rtol=rtol, atol=atol)

    # Larger, non-multiple batch with the default (large) tile: grid stays 1.
    x2 = jax.random.normal(kx2, (300, state_dim), dtype=jnp.float32)
    out2 = jax.block_until_ready(critic_forward(x2, params))
    ref2 = reference_forward(x2, params, act_dtype)
    assert out2.shape == (300, 1)
    np.testing.assert_allclose(np.asarray(out2), np.asarray(ref2), rtol=rtol, atol=atol)

    # Multi-tile grid (tile_b=128 -> 3 tiles) + non-zero biases to exercise the
    # bias-add path, batch padding, and the lane-dense (1, TB) output tiling.
    w1p, b1, w2p, b2, w3p, b3 = params
    kb1, kb2, kb3 = jax.random.split(kb, 3)
    h_pad = w1p.shape[0]
    b1n = (jnp.zeros((h_pad, 1), jnp.float32)
           .at[:hidden_size, :].set(0.1 * jax.random.normal(kb1, (hidden_size, 1))))
    b2n = (jnp.zeros((h_pad, 1), jnp.float32)
           .at[:hidden_size, :].set(0.1 * jax.random.normal(kb2, (hidden_size, 1))))
    b3n = 0.1 * jax.random.normal(kb3, (1, 1), dtype=jnp.float32)
    params_nz = (w1p, b1n, w2p, b2n, w3p, b3n)

    out3 = jax.block_until_ready(critic_forward(x2, params_nz, tile_b=128))
    ref3 = reference_forward(x2, params_nz, act_dtype)
    assert out3.shape == (300, 1)
    np.testing.assert_allclose(np.asarray(out3), np.asarray(ref3), rtol=rtol, atol=atol)

    print("KERNEL_OK")
</pallas_src>

<mosaic_0001>
module attributes {stable_mosaic.version = 11 : i64} {
  func.func @critic_kernel(%arg0: i32, %arg1: memref<16x128xbf16, #tpu.memory_space<vmem>>, %arg2: memref<128x16xbf16, #tpu.memory_space<vmem>>, %arg3: memref<128x1xf32, #tpu.memory_space<vmem>>, %arg4: memref<128x128xbf16, #tpu.memory_space<vmem>>, %arg5: memref<128x1xf32, #tpu.memory_space<vmem>>, %arg6: memref<1x128xbf16, #tpu.memory_space<vmem>>, %arg7: memref<1x1xf32, #tpu.memory_space<vmem>>, %arg8: memref<1x128xf32, #tpu.memory_space<vmem>>) attributes {dimension_semantics = [#tpu.dimension_semantics<parallel>], iteration_bounds = array<i64: 1>, scalar_prefetch = 0 : i64, scratch_operands = 0 : i64, tpu.core_type = #tpu.core_type<tc>, window_params = [{transform_indices = @transform_0, window_bounds = array<i64: 16, 128>}, {pipeline_mode = #tpu.pipeline_mode<synchronous>, transform_indices = @transform_1, window_bounds = array<i64: 128, 16>}, {pipeline_mode = #tpu.pipeline_mode<synchronous>, transform_indices = @transform_2, window_bounds = array<i64: 128, 1>}, {pipeline_mode = #tpu.pipeline_mode<synchronous>, transform_indices = @transform_3, window_bounds = array<i64: 128, 128>}, {pipeline_mode = #tpu.pipeline_mode<synchronous>, transform_indices = @transform_4, window_bounds = array<i64: 128, 1>}, {pipeline_mode = #tpu.pipeline_mode<synchronous>, transform_indices = @transform_5, window_bounds = array<i64: 1, 128>}, {pipeline_mode = #tpu.pipeline_mode<synchronous>, transform_indices = @transform_6, window_bounds = array<i64: 1, 1>}, {transform_indices = @transform_7, window_bounds = array<i64: 1, 128>}]} {
    %c0 = arith.constant 0 : index
    %c0_0 = arith.constant 0 : index
    %0 = vector.load %arg1[%c0, %c0_0] : memref<16x128xbf16, #tpu.memory_space<vmem>>, vector<16x128xbf16>
    %c0_1 = arith.constant 0 : index
    %c0_2 = arith.constant 0 : index
    %1 = vector.load %arg2[%c0_1, %c0_2] : memref<128x16xbf16, #tpu.memory_space<vmem>>, vector<128x16xbf16>
    %cst = arith.constant dense<0.000000e+00> : vector<128x128xf32>
    %2 = tpu.matmul %1, %0, %cst {dimension_numbers = #tpu.dot_dimension_numbers<[1], [0], [0], [1], [0, 0, 1, 1], [], []>} : vector<128x16xbf16>, vector<16x128xbf16>, vector<128x128xf32> -> vector<128x128xf32>
    %c0_3 = arith.constant 0 : index
    %c0_4 = arith.constant 0 : index
    %3 = vector.load %arg3[%c0_3, %c0_4] : memref<128x1xf32, #tpu.memory_space<vmem>>, vector<128x1xf32>
    %4 = vector.broadcast %3 : vector<128x1xf32> to vector<128x128xf32>
    %5 = arith.addf %2, %4 : vector<128x128xf32>
    %6 = arith.truncf %5 : vector<128x128xf32> to vector<128x128xbf16>
    %7 = math.tanh %6 : vector<128x128xbf16>
    %c0_5 = arith.constant 0 : index
    %c0_6 = arith.constant 0 : index
    %8 = vector.load %arg4[%c0_5, %c0_6] : memref<128x128xbf16, #tpu.memory_space<vmem>>, vector<128x128xbf16>
    %cst_7 = arith.constant dense<0.000000e+00> : vector<128x128xf32>
    %9 = tpu.matmul %8, %7, %cst_7 {dimension_numbers = #tpu.dot_dimension_numbers<[1], [0], [0], [1], [0, 0, 1, 1], [], []>} : vector<128x128xbf16>, vector<128x128xbf16>, vector<128x128xf32> -> vector<128x128xf32>
    %c0_8 = arith.constant 0 : index
    %c0_9 = arith.constant 0 : index
    %10 = vector.load %arg5[%c0_8, %c0_9] : memref<128x1xf32, #tpu.memory_space<vmem>>, vector<128x1xf32>
    %11 = vector.broadcast %10 : vector<128x1xf32> to vector<128x128xf32>
    %12 = arith.addf %9, %11 : vector<128x128xf32>
    %13 = arith.truncf %12 : vector<128x128xf32> to vector<128x128xbf16>
    %14 = math.tanh %13 : vector<128x128xbf16>
    %c0_10 = arith.constant 0 : index
    %c0_11 = arith.constant 0 : index
    %15 = vector.load %arg6[%c0_10, %c0_11] : memref<1x128xbf16, #tpu.memory_space<vmem>>, vector<1x128xbf16>
    %cst_12 = arith.constant dense<0.000000e+00> : vector<1x128xf32>
    %16 = tpu.matmul %15, %14, %cst_12 {dimension_numbers = #tpu.dot_dimension_numbers<[1], [0], [0], [1], [0, 0, 1, 1], [], []>} : vector<1x128xbf16>, vector<128x128xbf16>, vector<1x128xf32> -> vector<1x128xf32>
    %c0_13 = arith.constant 0 : index
    %c0_14 = arith.constant 0 : index
    %17 = vector.load %arg7[%c0_13, %c0_14] : memref<1x1xf32, #tpu.memory_space<vmem>>, vector<1x1xf32>
    %18 = vector.broadcast %17 : vector<1x1xf32> to vector<1x128xf32>
    %19 = arith.addf %16, %18 : vector<1x128xf32>
    %c0_15 = arith.constant 0 : index
    %c0_16 = arith.constant 0 : index
    %20 = vector.load %arg8[%c0_15, %c0_16] : memref<1x128xf32, #tpu.memory_space<vmem>>, vector<1x128xf32>
    tpu.vector_store %arg8[%c0_15, %c0_16], %19 {strides = array<i32>} : memref<1x128xf32, #tpu.memory_space<vmem>>, vector<1x128xf32>,
    return
  }
  func.func @transform_0(%arg0: i32) -> (i32, i32) {
    %c0_i32 = arith.constant 0 : i32
    %c0_i32_0 = arith.constant 0 : i32
    return %c0_i32, %arg0 : i32, i32
  }
  func.func @transform_1(%arg0: i32) -> (i32, i32) {
    %c0_i32 = arith.constant 0 : i32
    %c0_i32_0 = arith.constant 0 : i32
    %c0_i32_1 = arith.constant 0 : i32
    return %c0_i32, %c0_i32_0 : i32, i32
  }
  func.func @transform_2(%arg0: i32) -> (i32, i32) {
    %c0_i32 = arith.constant 0 : i32
    %c0_i32_0 = arith.constant 0 : i32
    %c0_i32_1 = arith.constant 0 : i32
    return %c0_i32, %c0_i32_0 : i32, i32
  }
  func.func @transform_3(%arg0: i32) -> (i32, i32) {
    %c0_i32 = arith.constant 0 : i32
    %c0_i32_0 = arith.constant 0 : i32
    %c0_i32_1 = arith.constant 0 : i32
    return %c0_i32, %c0_i32_0 : i32, i32
  }
  func.func @transform_4(%arg0: i32) -> (i32, i32) {
    %c0_i32 = arith.constant 0 : i32
    %c0_i32_0 = arith.constant 0 : i32
    %c0_i32_1 = arith.constant 0 : i32
    return %c0_i32, %c0_i32_0 : i32, i32
  }
  func.func @transform_5(%arg0: i32) -> (i32, i32) {
    %c0_i32 = arith.constant 0 : i32
    %c0_i32_0 = arith.constant 0 : i32
    %c0_i32_1 = arith.constant 0 : i32
    return %c0_i32, %c0_i32_0 : i32, i32
  }
  func.func @transform_6(%arg0: i32) -> (i32, i32) {
    %c0_i32 = arith.constant 0 : i32
    %c0_i32_0 = arith.constant 0 : i32
    %c0_i32_1 = arith.constant 0 : i32
    return %c0_i32, %c0_i32_0 : i32, i32
  }
  func.func @transform_7(%arg0: i32) -> (i32, i32) {
    %c0_i32 = arith.constant 0 : i32
    %c0_i32_0 = arith.constant 0 : i32
    return %c0_i32, %arg0 : i32, i32
  }
}

</mosaic_0001>

<bundles_post_ra>
// kernel: tpu_custom_call.1
= control target key start
LH: loop header
LB: loop body
LE: loop exit
PB: predicated region body
PF: predicated region fallthrough
CT: control target
= control target key end

     0   :  { %s1036_s0 = inlined_call_operand.vmem [shape: bf16[16,128], index: 0, kind: input, shape index: {}]   ;;  %s1037_s1 = inlined_call_operand.vmem [shape: bf16[128,16], index: 1, kind: input, shape index: {}]   ;;  %s1038_s2 = inlined_call_operand.vmem [shape: f32[128,1], index: 2, kind: input, shape index: {}]   ;;  %s1039_s3 = inlined_call_operand.vmem [shape: bf16[128,128], index: 3, kind: input, shape index: {}]   ;;  %s1040_s4 = inlined_call_operand.vmem [shape: f32[128,1], index: 4, kind: input, shape index: {}]   ;;  %s1041_s5 = inlined_call_operand.vmem [shape: bf16[1,128], index: 5, kind: input, shape index: {}]   ;;  %s1042_s6 = inlined_call_operand.<no memory space> [shape: f32[1,1], index: 6, kind: input, shape index: {}]   ;;  %s1043_s7 = inlined_call_operand.hbm [shape: f32[1,128], index: 7, kind: output, shape index: {}]  }
   0x1   :  { %v12_v0 = vstv %s1042_s6 }
   0x2   :  { %13 = vst [vmem:[#allocation2] sm:$0x1] %v12_v0 }
   0x3   :  { %v62_v1 = vld [vmem:[%s1038_s2 + $0x70] sm:$0xff]  ;;  %v683_v2 = vld [vmem:[%s1036_s0] sm:$0xff]  ;;  %v804_v3 = vmov 0   ;;  %vm190_vm0 = vcmask 130048   ;;  %v63_v8 = vld [vmem:[%s1038_s2 + $0x78] sm:$0xff] }
   0x4   :  { %711 = vset.pattern.permute.xlu0 %v804_v3  ;;  %v684_v4 = vld [vmem:[%s1037_s1] sm:$0xff]  ;;  %713 = vset.pattern.permute.xlu2 %v804_v3  ;;  %v58_v6 = vld [vmem:[%s1038_s2 + $0x50] sm:$0xff] }
   0x5   :  { %v60_v5 = vld [vmem:[%s1038_s2 + $0x60] sm:$0xff]  ;;  %136 = vperm.xlu0 %711, %v62_v1   ;;  %222 = vmatpush.bf16.msra.mxu0 %v683_v2  ;;  %v690_v7 = vld [vmem:[%s1037_s1 + $0x30] sm:$0xff] }
   0x6   :  { %712 = vset.pattern.permute.xlu1 %v804_v3  ;;  %116 = vperm.xlu2 %713, %v58_v6  }
   0x7   :  { %126 = vperm.xlu1 %712, %v60_v5   ;;  %700 = vmatpush.bf16.msra.mxu2 %v683_v2 }
   0x8   :  { %643 = vmatmul.msk.bf16.vlgmr.msra.gmra.mxu0 %vm190_vm0, %v684_v4 }
   0xa   :  { %649 = vmatmul.msk.bf16.vlgmr.msra.gmra.mxu2 %vm190_vm0, %v690_v7 }
   0xb   :  { %14 = vsyncpa [#allocation4], 0  ;;  %v59_v9 = vld [vmem:[%s1038_s2 + $0x58] sm:$0xff]  ;;  %v61_v10 = vld [vmem:[%s1038_s2 + $0x68] sm:$0xff]  ;;  %s805_s21 = smov [#allocation3]   ;;  %s598_s25 = sshll.u32 %s1043_s7, 4  ;;  %s599_s25 = int_to_ptr.hbm [resolvable:$true] %s598_s25 }
   0xc   :  { %v56_v11 = vld [vmem:[%s1038_s2 + $0x40] sm:$0xff]  ;;  %v54_v12 = vld [vmem:[%s1038_s2 + $0x30] sm:$0xff]  ;;  %v685_v13 = vld [vmem:[%s1037_s1 + $0x8] sm:$0xff]  ;;  %s596_s22 = sshll.u32 %s805_s21, 4  ;;  %s597_s22 = int_to_ptr.vmem [resolvable:$true] %s596_s22 }
   0xd   :  { %141 = vperm.xlu0 %711, %v63_v8   ;;  %v57_v14 = vld [vmem:[%s1038_s2 + $0x48] sm:$0xff]  ;;  %v691_v15 = vld [vmem:[%s1037_s1 + $0x38] sm:$0xff]  ;;  %v52_v18 = vld [vmem:[%s1038_s2 + $0x20] sm:$0xff] }
   0xe   :  { %121 = vperm.xlu2 %713, %v59_v9   ;;  %v55_v16 = vld [vmem:[%s1038_s2 + $0x38] sm:$0xff]  ;;  %v53_v17 = vld [vmem:[%s1038_s2 + $0x28] sm:$0xff]  ;;  %v50_v19 = vld [vmem:[%s1038_s2 + $0x10] sm:$0xff] }
   0xf   :  { %131 = vperm.xlu1 %712, %v61_v10   ;;  %v48_v20 = vld [vmem:[%s1038_s2] sm:$0xff]  ;;  %v686_v21 = vld [vmem:[%s1037_s1 + $0x10] sm:$0xff]  ;;  %v51_v22 = vld [vmem:[%s1038_s2 + $0x18] sm:$0xff] }
  0x10   :  { %v49_v23 = vld [vmem:[%s1038_s2 + $0x8] sm:$0xff]  ;;  %v342_v24 = vld [vmem:[%s1040_s4 + $0x70] sm:$0xff]  ;;  %v343_v25 = vld [vmem:[%s1040_s4 + $0x78] sm:$0xff] }
  0x11   :  { %v340_v26 = vld [vmem:[%s1040_s4 + $0x60] sm:$0xff]  ;;  %v687_v27 = vld [vmem:[%s1037_s1 + $0x18] sm:$0xff]  ;;  %v341_v28 = vld [vmem:[%s1040_s4 + $0x68] sm:$0xff] }
  0x12   :  { %v338_v29 = vld [vmem:[%s1040_s4 + $0x50] sm:$0xff]  ;;  %v339_v30 = vld [vmem:[%s1040_s4 + $0x58] sm:$0xff]  ;;  %v337_v31 = vld [vmem:[%s1040_s4 + $0x48] sm:$0xff] }
  0x13   :  { %v336_v32 = vld [vmem:[%s1040_s4 + $0x40] sm:$0xff]  ;;  %v334_v33 = vld [vmem:[%s1040_s4 + $0x30] sm:$0xff]  ;;  %v335_v36 = vld [vmem:[%s1040_s4 + $0x38] sm:$0xff] }
  0x14   :  { %v332_v34 = vld [vmem:[%s1040_s4 + $0x20] sm:$0xff]  ;;  %v333_v37 = vld [vmem:[%s1040_s4 + $0x28] sm:$0xff]  ;;  %v331_v38 = vld [vmem:[%s1040_s4 + $0x18] sm:$0xff] }
  0x15   :  { %106 = vperm.xlu0 %711, %v56_v11   ;;  %v688_v35 = vld [vmem:[%s1037_s1 + $0x20] sm:$0xff]  ;;  %v330_v39 = vld [vmem:[%s1040_s4 + $0x10] sm:$0xff]  ;;  %v689_v41 = vld [vmem:[%s1037_s1 + $0x28] sm:$0xff] }
  0x16   :  { %96 = vperm.xlu2 %713, %v54_v12   ;;  %v328_v40 = vld [vmem:[%s1040_s4] sm:$0xff]  ;;  %v329_v42 = vld [vmem:[%s1040_s4 + $0x8] sm:$0xff] }
  0x17   :  { %111 = vperm.xlu1 %712, %v57_v14   ;;  %v570_v43 = vld [vmem:[#allocation2] sm:$0x1] }
  0x18   :  { %644 = vmatmul.msk.bf16.gmra.mxu0 %vm190_vm0, %v685_v13 }
  0x1a   :  { %650 = vmatmul.msk.bf16.gmra.mxu2 %vm190_vm0, %v691_v15 }
  0x1d   :  { %101 = vperm.xlu0 %711, %v55_v16  }
  0x1e   :  { %91 = vperm.xlu2 %713, %v53_v17  }
  0x1f   :  { %86 = vperm.xlu1 %712, %v52_v18  }
  0x25   :  { %76 = vperm.xlu0 %711, %v50_v19  }
  0x26   :  { %66 = vperm.xlu2 %713, %v48_v20  }
  0x27   :  { %81 = vperm.xlu1 %712, %v51_v22  }
  0x28   :  { %645 = vmatmul.msk.bf16.gmra.mxu0 %vm190_vm0, %v686_v21 }
  0x2d   :  { %71 = vperm.xlu0 %711, %v49_v23  }
  0x2e   :  { %421 = vperm.xlu2 %713, %v343_v25  }
  0x2f   :  { %416 = vperm.xlu1 %712, %v342_v24  }
  0x35   :  { %406 = vperm.xlu0 %711, %v340_v26  }
  0x36   :  { %396 = vperm.xlu2 %713, %v338_v29  }
  0x37   :  { %411 = vperm.xlu1 %712, %v341_v28  }
  0x38   :  { %646 = vmatmul.msk.bf16.gmra.mxu0 %vm190_vm0, %v687_v27 }
  0x3d   :  { %401 = vperm.xlu0 %711, %v339_v30  }
  0x3e   :  { %391 = vperm.xlu2 %713, %v337_v31  }
  0x3f   :  { %386 = vperm.xlu1 %712, %v336_v32  }
  0x45   :  { %376 = vperm.xlu0 %711, %v334_v33  }
  0x46   :  { %366 = vperm.xlu2 %713, %v332_v34  }
  0x47   :  { %381 = vperm.xlu1 %712, %v335_v36  }
  0x48   :  { %647 = vmatmul.msk.bf16.gmra.mxu0 %vm190_vm0, %v688_v35 }
  0x4d   :  { %371 = vperm.xlu0 %711, %v333_v37  }
  0x4e   :  { %361 = vperm.xlu2 %713, %v331_v38  }
  0x4f   :  { %356 = vperm.xlu1 %712, %v330_v39  }
  0x55   :  { %346 = vperm.xlu0 %711, %v328_v40  }
  0x56   :  { %573 = vperm.xlu2 %713, %v570_v43  }
  0x57   :  { %351 = vperm.xlu1 %712, %v329_v42  }
  0x58   :  { %648 = vmatmul.msk.bf16.gmra.mxu0 %vm190_vm0, %v689_v41 }
  0x60   :  { %v980_v44 = vpop.permute.xlu2 %116 }
  0x68   :  { %v982_v47 = vpop.permute.xlu2 %121 }
  0x70   :  { %v97_v52 = vpop.permute.xlu2 %96 }
  0x77   :  { %v137_v45 = vpop.permute.xlu0 %136 }
  0x78   :  { %v92_v58 = vpop.permute.xlu2 %91 }
  0x79   :  { %v127_v46 = vpop.permute.xlu1 %126 }
  0x7f   :  { %v142_v48 = vpop.permute.xlu0 %141 }
  0x80   :  { %v67_v63 = vpop.permute.xlu2 %66 }
  0x81   :  { %v132_v49 = vpop.permute.xlu1 %131 }
  0x85   :  { %v224_v50 = vpop.f32.mrf.mxu0 }
  0x86   :  { %v225_v7 = vadd.f32 %v224_v50, %v67_v63 }
  0x87   :  { %v107_v51 = vpop.permute.xlu0 %106 }
  0x89   :  { %v112_v53 = vpop.permute.xlu1 %111 }
  0x8d   :  { %v226_v54 = vpop.f32.mrf.mxu0  ;;  %v254_v55 = vpop.f32.mrf.mxu2 }
  0x8e   :  { %v255_v4 = vadd.f32 %v254_v55, %v127_v46 }
  0x8f   :  { %v102_v56 = vpop.permute.xlu0 %101 }
  0x91   :  { %v984_v57 = vpop.permute.xlu1 %86 }
  0x95   :  { %v229_v59 = vpop.f32.mrf.mxu0  ;;  %v256_v60 = vpop.f32.mrf.mxu2 }
  0x96   :  { %v257_v5 = vadd.f32 %v256_v60, %v132_v49 }
  0x97   :  { %v77_v61 = vpop.permute.xlu0 %76 }
  0x98   :  { %v230_v2 = vadd.f32 %v229_v59, %v77_v61  ;;  %v270_v11 = vpack.c.bf16 %v257_v5, %v255_v4 }
  0x99   :  { %v82_v62 = vpop.permute.xlu1 %81 }
  0x9a   :  { %v284_v15 = vunpack.c.l.bf16 %v270_v11  ;;  %v285_v17 = vunpack.c.h.bf16 %v270_v11 }
  0x9c   :  { %714 = vtanh.f32 %v284_v15  ;;  %v697_v15 = vld [vmem:[%s1039_s3 + $0x28] sm:$0xff] }
  0x9d   :  { %v231_v0 = vpop.f32.mrf.mxu0  ;;  %v259_v1 = vpop.f32.mrf.mxu2  ;;  %716 = vtanh.f32 %v285_v17  ;;  %v698_v17 = vld [vmem:[%s1039_s3 + $0x30] sm:$0xff] }
  0x9e   :  { %v232_v3 = vadd.f32 %v231_v0, %v82_v62  ;;  %v260_v12 = vadd.f32 %v259_v1, %v137_v45 }
  0x9f   :  { %v72_v6 = vpop.permute.xlu0 %71 }
  0xa0   :  { %v986_v8 = vpack.c.bf16 %v232_v3, %v230_v2  ;;  %v227_v9 = vadd.f32 %v226_v54, %v72_v6 }
  0xa2   :  { %v988_v10 = vpack.c.bf16 %v227_v9, %v225_v7  ;;  %v715_v22 = vpop.eup %714  ;;  %v274_v60 = vunpack.c.l.bf16 %v986_v8 }
  0xa3   :  { %v717_v23 = vpop.eup %716 }
  0xa4   :  { %v310_v28 = vpack.c.bf16 %v717_v23, %v715_v22  ;;  %v272_v0 = vunpack.c.l.bf16 %v988_v10  ;;  %v273_v1 = vunpack.c.h.bf16 %v988_v10  ;;  %v692_v10 = vld [vmem:[%s1039_s3] sm:$0xff] }
  0xa5   :  { %v234_v13 = vpop.f32.mrf.mxu0  ;;  %v261_v14 = vpop.f32.mrf.mxu2 }
  0xa6   :  { %v262_v16 = vadd.f32 %v261_v14, %v142_v48  ;;  %v235_v50 = vadd.f32 %v234_v13, %v984_v57  ;;  %v275_v57 = vunpack.c.h.bf16 %v986_v8  ;;  %v696_v13 = vld [vmem:[%s1039_s3 + $0x20] sm:$0xff]  ;;  %v693_v14 = vld [vmem:[%s1039_s3 + $0x8] sm:$0xff] }
  0xa8   :  { %v271_v18 = vpack.c.bf16 %v262_v16, %v260_v12  ;;  %v694_v16 = vld [vmem:[%s1039_s3 + $0x10] sm:$0xff] }
  0xaa   :  { %v286_v19 = vunpack.c.l.bf16 %v271_v18  ;;  %v287_v20 = vunpack.c.h.bf16 %v271_v18  ;;  %v695_v18 = vld [vmem:[%s1039_s3 + $0x18] sm:$0xff] }
  0xac   :  { %718 = vtanh.f32 %v286_v19  ;;  %v699_v19 = vld [vmem:[%s1039_s3 + $0x38] sm:$0xff] }
  0xad   :  { %v236_v21 = vpop.f32.mrf.mxu0  ;;  %720 = vtanh.f32 %v287_v20 }
  0xae   :  { %v237_v42 = vadd.f32 %v236_v21, %v92_v58 }
  0xb2   :  { %v719_v24 = vpop.eup %718 }
  0xb3   :  { %v721_v25 = vpop.eup %720 }
  0xb4   :  { %v311_v26 = vpack.c.bf16 %v721_v25, %v719_v24 }
  0xb5   :  { %v239_v27 = vpop.f32.mrf.mxu0 }
  0xb6   :  { %472 = vmatpush.bf16.msra.mxu1 %v311_v26  ;;  %701 = vmatpush.bf16.msra.mxu3 %v311_v26  ;;  %v240_v40 = vadd.f32 %v239_v27, %v97_v52 }
  0xba   :  { %473 = vmatpush.bf16.msra.mxu1 %v310_v28  ;;  %702 = vmatpush.bf16.msra.mxu3 %v310_v28  ;;  %v417_v28 = vpop.permute.xlu1 %416 }
  0xbd   :  { %v241_v29 = vpop.f32.mrf.mxu0 }
  0xbe   :  { %v242_v36 = vadd.f32 %v241_v29, %v102_v56  ;;  %v422_v29 = vpop.permute.xlu2 %421 }
  0xc0   :  { %v267_v43 = vpack.c.bf16 %v242_v36, %v240_v40 }
  0xc2   :  { %v279_v54 = vunpack.c.h.bf16 %v267_v43 }
  0xc5   :  { %v244_v30 = vpop.f32.mrf.mxu0 }
  0xc6   :  { %v245_v34 = vadd.f32 %v244_v30, %v107_v51  ;;  %v266_v51 = vpack.c.bf16 %v237_v42, %v235_v50 }
  0xc8   :  { %v276_v55 = vunpack.c.l.bf16 %v266_v51  ;;  %v277_v52 = vunpack.c.h.bf16 %v266_v51 }
  0xcd   :  { %v246_v31 = vpop.f32.mrf.mxu0 }
  0xce   :  { %v247_v33 = vadd.f32 %v246_v31, %v112_v53  ;;  %v278_v53 = vunpack.c.l.bf16 %v267_v43 }
  0xd0   :  { %v268_v37 = vpack.c.bf16 %v247_v33, %v245_v34  ;;  %v407_v33 = vpop.permute.xlu0 %406 }
  0xd2   :  { %v280_v45 = vunpack.c.l.bf16 %v268_v37  ;;  %v281_v49 = vunpack.c.h.bf16 %v268_v37 }
  0xd5   :  { %v249_v32 = vpop.f32.mrf.mxu0 }
  0xd6   :  { %v250_v38 = vadd.f32 %v249_v32, %v980_v44  ;;  %v412_v32 = vpop.permute.xlu1 %411 }
  0xdd   :  { %v251_v35 = vpop.f32.mrf.mxu0 }
  0xde   :  { %v252_v39 = vadd.f32 %v251_v35, %v982_v47  ;;  %v397_v35 = vpop.permute.xlu2 %396  ;;  %v387_v37 = vpop.permute.xlu1 %386 }
  0xe0   :  { %v269_v41 = vpack.c.bf16 %v252_v39, %v250_v38  ;;  %v402_v38 = vpop.permute.xlu0 %401 }
  0xe2   :  { %v282_v46 = vunpack.c.l.bf16 %v269_v41  ;;  %v283_v48 = vunpack.c.h.bf16 %v269_v41 }
  0xe4   :  { %722 = vtanh.f32 %v282_v46 }
  0xe5   :  { %724 = vtanh.f32 %v283_v48 }
  0xe6   :  { %726 = vtanh.f32 %v280_v45  ;;  %v392_v40 = vpop.permute.xlu2 %391  ;;  %v382_v45 = vpop.permute.xlu1 %381 }
  0xe7   :  { %728 = vtanh.f32 %v281_v49 }
  0xe8   :  { %730 = vtanh.f32 %v278_v53  ;;  %v377_v53 = vpop.permute.xlu0 %376 }
  0xe9   :  { %732 = vtanh.f32 %v279_v54 }
  0xea   :  { %v723_v44 = vpop.eup %722  ;;  %734 = vtanh.f32 %v276_v55 }
  0xeb   :  { %v725_v47 = vpop.eup %724  ;;  %736 = vtanh.f32 %v277_v52 }
  0xec   :  { %v727_v56 = vpop.eup %726  ;;  %v309_v58 = vpack.c.bf16 %v725_v47, %v723_v44  ;;  %738 = vtanh.f32 %v274_v60 }
  0xed   :  { %v729_v59 = vpop.eup %728  ;;  %740 = vtanh.f32 %v275_v57 }
  0xee   :  { %474 = vmatpush.bf16.msra.mxu1 %v309_v58  ;;  %703 = vmatpush.bf16.msra.mxu3 %v309_v58  ;;  %v731_v61 = vpop.eup %730  ;;  %v308_v62 = vpack.c.bf16 %v729_v59, %v727_v56  ;;  %742 = vtanh.f32 %v272_v0  ;;  %v367_v59 = vpop.permute.xlu2 %366 }
  0xef   :  { %v733_v63 = vpop.eup %732  ;;  %744 = vtanh.f32 %v273_v1  ;;  %v357_v1 = vpop.permute.xlu1 %356 }
  0xf0   :  { %v735_v2 = vpop.eup %734  ;;  %v307_v3 = vpack.c.bf16 %v733_v63, %v731_v61 }
  0xf1   :  { %v737_v4 = vpop.eup %736 }
  0xf2   :  { %475 = vmatpush.bf16.msra.mxu1 %v308_v62  ;;  %704 = vmatpush.bf16.msra.mxu3 %v308_v62  ;;  %v739_v5 = vpop.eup %738  ;;  %v306_v6 = vpack.c.bf16 %v737_v4, %v735_v2  ;;  %v372_v4 = vpop.permute.xlu0 %371 }
  0xf3   :  { %v741_v7 = vpop.eup %740 }
  0xf4   :  { %v743_v8 = vpop.eup %742  ;;  %v305_v9 = vpack.c.bf16 %v741_v7, %v739_v5 }
  0xf5   :  { %v745_v11 = vpop.eup %744 }
  0xf6   :  { %476 = vmatpush.bf16.msra.mxu1 %v307_v3  ;;  %705 = vmatpush.bf16.msra.mxu3 %v307_v3  ;;  %v304_v12 = vpack.c.bf16 %v745_v11, %v743_v8 }
  0xfa   :  { %477 = vmatpush.bf16.msra.mxu1 %v306_v6  ;;  %706 = vmatpush.bf16.msra.mxu3 %v306_v6 }
  0xfe   :  { %478 = vmatpush.bf16.msra.mxu1 %v305_v9  ;;  %707 = vmatpush.bf16.msra.mxu3 %v305_v9 }
 0x102   :  { %479 = vmatpush.bf16.msra.mxu1 %v304_v12  ;;  %708 = vmatpush.bf16.msra.mxu3 %v304_v12 }
 0x105   :  { %480 = vmatmul.bf16.vlgmr.msra.gmra.mxu1 %v692_v10  ;;  %500 = vmatmul.bf16.vlgmr.msra.gmra.mxu3 %v696_v13 }
 0x115   :  { %485 = vmatmul.bf16.gmra.mxu1 %v693_v14  ;;  %505 = vmatmul.bf16.gmra.mxu3 %v697_v15  ;;  %v362_v15 = vpop.permute.xlu2 %361 }
 0x125   :  { %490 = vmatmul.bf16.gmra.mxu1 %v694_v16  ;;  %510 = vmatmul.bf16.gmra.mxu3 %v698_v17 }
 0x135   :  { %495 = vmatmul.bf16.gmra.mxu1 %v695_v18  ;;  %515 = vmatmul.bf16.gmra.mxu3 %v699_v19 }
 0x182   :  { %v1021_v20 = vpop.f32.mrf.mxu1 }
 0x188   :  { %v501_v21 = vpop.f32.mrf.mxu3 }
 0x189   :  { %v502_v61 = vadd.f32 %v501_v21, %v387_v37 }
 0x18a   :  { %v1023_v22 = vpop.f32.mrf.mxu1 }
 0x190   :  { %v503_v23 = vpop.f32.mrf.mxu3 }
 0x191   :  { %v504_v55 = vadd.f32 %v503_v23, %v392_v40 }
 0x192   :  { %v1025_v24 = vpop.f32.mrf.mxu1 }
 0x193   :  { %v525_v62 = vpack.c.bf16 %v504_v55, %v502_v61  ;;  %v487_v23 = vadd.f32 %v1025_v24, %v357_v1  ;;  %v574_v55 = vpop.permute.xlu2 %573 }
 0x195   :  { %v537_v6 = vunpack.c.l.bf16 %v525_v62  ;;  %v538_v11 = vunpack.c.h.bf16 %v525_v62 }
 0x198   :  { %v506_v25 = vpop.f32.mrf.mxu3 }
 0x199   :  { %v507_v54 = vadd.f32 %v506_v25, %v397_v35 }
 0x19a   :  { %v488_v26 = vpop.f32.mrf.mxu1 }
 0x19b   :  { %v489_v16 = vadd.f32 %v488_v26, %v362_v15 }
 0x1a0   :  { %v508_v27 = vpop.f32.mrf.mxu3 }
 0x1a1   :  { %v509_v48 = vadd.f32 %v508_v27, %v402_v38 }
 0x1a2   :  { %v491_v30 = vpop.f32.mrf.mxu1 }
 0x1a3   :  { %v526_v47 = vpack.c.bf16 %v509_v48, %v507_v54  ;;  %v492_v10 = vadd.f32 %v491_v30, %v367_v59 }
 0x1a5   :  { %v539_v63 = vunpack.c.l.bf16 %v526_v47  ;;  %v540_v2 = vunpack.c.h.bf16 %v526_v47  ;;  %v576_v47 = vperm.slane %v574_v55, 0 }
 0x1a8   :  { %v511_v31 = vpop.f32.mrf.mxu3 }
 0x1a9   :  { %v512_v43 = vadd.f32 %v511_v31, %v407_v33  ;;  %v522_v31 = vpack.c.bf16 %v489_v16, %v487_v23 }
 0x1aa   :  { %v493_v36 = vpop.f32.mrf.mxu1 }
 0x1ab   :  { %v494_v7 = vadd.f32 %v493_v36, %v372_v4  ;;  %v531_v38 = vunpack.c.l.bf16 %v522_v31  ;;  %v532_v24 = vunpack.c.h.bf16 %v522_v31 }
 0x1ad   :  { %v523_v17 = vpack.c.bf16 %v494_v7, %v492_v10 }
 0x1af   :  { %v533_v30 = vunpack.c.l.bf16 %v523_v17  ;;  %v534_v33 = vunpack.c.h.bf16 %v523_v17 }
 0x1b0   :  { %v513_v34 = vpop.f32.mrf.mxu3 }
 0x1b1   :  { %v514_v42 = vadd.f32 %v513_v34, %v412_v32  ;;  %v347_v32 = vpop.permute.xlu0 %346 }
 0x1b2   :  { %v496_v41 = vpop.f32.mrf.mxu1  ;;  %v482_v34 = vadd.f32 %v1021_v20, %v347_v32 }
 0x1b3   :  { %v527_v49 = vpack.c.bf16 %v514_v42, %v512_v43  ;;  %v497_v3 = vadd.f32 %v496_v41, %v377_v53 }
 0x1b5   :  { %v541_v52 = vunpack.c.l.bf16 %v527_v49  ;;  %v542_v60 = vunpack.c.h.bf16 %v527_v49 }
 0x1b8   :  { %v516_v39 = vpop.f32.mrf.mxu3 }
 0x1b9   :  { %v517_v50 = vadd.f32 %v516_v39, %v417_v28  ;;  %v352_v28 = vpop.permute.xlu1 %351 }
 0x1ba   :  { %v498_v57 = vpop.f32.mrf.mxu1 }
 0x1bb   :  { %v499_v0 = vadd.f32 %v498_v57, %v382_v45 }
 0x1bd   :  { %v524_v8 = vpack.c.bf16 %v499_v0, %v497_v3 }
 0x1bf   :  { %v535_v18 = vunpack.c.l.bf16 %v524_v8  ;;  %v536_v19 = vunpack.c.h.bf16 %v524_v8 }
 0x1c0   :  { %v518_v46 = vpop.f32.mrf.mxu3 }
 0x1c1   :  { %v519_v51 = vadd.f32 %v518_v46, %v422_v29  ;;  %v484_v29 = vadd.f32 %v1023_v22, %v352_v28 }
 0x1c3   :  { %v528_v44 = vpack.c.bf16 %v519_v51, %v517_v50  ;;  %v521_v37 = vpack.c.bf16 %v484_v29, %v482_v34 }
 0x1c5   :  { %v543_v56 = vunpack.c.l.bf16 %v528_v44  ;;  %v544_v58 = vunpack.c.h.bf16 %v528_v44  ;;  %v529_v41 = vunpack.c.l.bf16 %v521_v37  ;;  %v530_v42 = vunpack.c.h.bf16 %v521_v37  ;;  %v569_v44 = vld [vmem:[%s1041_s5] sm:$0x1] }
 0x1c7   :  { %746 = vtanh.f32 %v543_v56 }
 0x1c8   :  { %748 = vtanh.f32 %v544_v58 }
 0x1c9   :  { %750 = vtanh.f32 %v541_v52 }
 0x1ca   :  { %752 = vtanh.f32 %v542_v60 }
 0x1cb   :  { %754 = vtanh.f32 %v539_v63 }
 0x1cc   :  { %756 = vtanh.f32 %v540_v2 }
 0x1cd   :  { %v747_v5 = vpop.eup %746  ;;  %758 = vtanh.f32 %v537_v6 }
 0x1ce   :  { %v749_v9 = vpop.eup %748  ;;  %760 = vtanh.f32 %v538_v11 }
 0x1cf   :  { %v751_v12 = vpop.eup %750  ;;  %v568_v13 = vpack.c.bf16 %v749_v9, %v747_v5  ;;  %762 = vtanh.f32 %v535_v18 }
 0x1d0   :  { %v753_v14 = vpop.eup %752  ;;  %764 = vtanh.f32 %v536_v19 }
 0x1d1   :  { %577 = vmatpush.bf16.msrb.mxu2 %v568_v13  ;;  %v755_v21 = vpop.eup %754  ;;  %v567_v25 = vpack.c.bf16 %v753_v14, %v751_v12  ;;  %766 = vtanh.f32 %v533_v30 }
 0x1d2   :  { %v757_v27 = vpop.eup %756  ;;  %768 = vtanh.f32 %v534_v33 }
 0x1d3   :  { %v759_v26 = vpop.eup %758  ;;  %v566_v35 = vpack.c.bf16 %v757_v27, %v755_v21  ;;  %770 = vtanh.f32 %v531_v38 }
 0x1d4   :  { %v761_v36 = vpop.eup %760  ;;  %772 = vtanh.f32 %v532_v24 }
 0x1d5   :  { %578 = vmatpush.bf16.msrb.mxu2 %v567_v25  ;;  %v763_v39 = vpop.eup %762  ;;  %v565_v22 = vpack.c.bf16 %v761_v36, %v759_v26  ;;  %774 = vtanh.f32 %v529_v41 }
 0x1d6   :  { %v765_v40 = vpop.eup %764  ;;  %776 = vtanh.f32 %v530_v42 }
 0x1d7   :  { %v767_v43 = vpop.eup %766  ;;  %v564_v45 = vpack.c.bf16 %v765_v40, %v763_v39 }
 0x1d8   :  { %v769_v46 = vpop.eup %768 }
 0x1d9   :  { %579 = vmatpush.bf16.msrb.mxu2 %v566_v35  ;;  %v771_v20 = vpop.eup %770  ;;  %v563_v48 = vpack.c.bf16 %v769_v46, %v767_v43 }
 0x1da   :  { %v773_v49 = vpop.eup %772 }
 0x1db   :  { %v775_v50 = vpop.eup %774  ;;  %v562_v51 = vpack.c.bf16 %v773_v49, %v771_v20 }
 0x1dc   :  { %v777_v53 = vpop.eup %776 }
 0x1dd   :  { %580 = vmatpush.bf16.msrb.mxu2 %v565_v22  ;;  %v561_v54 = vpack.c.bf16 %v777_v53, %v775_v50 }
 0x1e1   :  { %581 = vmatpush.bf16.msrb.mxu2 %v564_v45 }
 0x1e5   :  { %582 = vmatpush.bf16.msrb.mxu2 %v563_v48 }
 0x1e9   :  { %583 = vmatpush.bf16.msrb.mxu2 %v562_v51 }
 0x1ed   :  { %584 = vmatpush.bf16.msrb.mxu2 %v561_v54 }
 0x1f0   :  { %585 = vmatmul.bf16.vlgmr.msrb.gmra.mxu2 %v569_v44 }
 0x273   :  { %v586_v52 = vpop.f32.mrf.mxu2 }
 0x274   :  { %v587_v56 = vadd.f32 %v586_v52, %v576_v47 }
 0x276   :  { %590 = vst [vmem:[#allocation3] sm:$0x1] %v587_v56 }
 0x277   :  { %601 = dma.vmem_to_hbm [thread:$0]  %s597_s22, 16, %s599_s25, [#allocation4]  }
 0x27b   :  { %v588_v58 = vpop.f32.mrf.mxu2 }
 0x27c   :  { %802 = dma.done.wait [#allocation4], 16  }
 0x27d   :  { %803 = vsyncadd [#allocation4], 4294967280 }
 0x27e   :  { %606 = vsyncpa [#allocation4], 1 }

</bundles_post_ra>
